<compile_context>
chip_gen: v7x
topology: tpu7x:2x2x1
jax: 0.10.0
libtpu: 0.0.40
codegen_flags: <defaults>
</compile_context>

<pallas_src>
import functools
import math

import jax
import jax.numpy as jnp
from jax.experimental import pallas as pl
from jax.experimental.pallas import tpu as pltpu


def _round_up(x, n):
    return -(-x // n) * n


# Measured HBM-roofline fractions for tiled streaming (v6e tiled-add sweep:
# 128-wide ~29%, 256 ~63%, 512 ~85%, >=1024 ~86%).
_DMA_EFF = {128: 0.29, 256: 0.63, 384: 0.75, 512: 0.85, 640: 0.85, 768: 0.86, 896: 0.86}


def _dma_eff(tile):
    return _DMA_EFF.get(tile, 0.86 if tile >= 512 else 0.29)


def _vmem_plan():
    """Generation-aware VMEM budgeting.

    v5e/v6e: 128 MiB physical per TensorCore -> scoped limit ~100 MiB.
    v7x:      64 MiB physical per TensorCore -> scoped limit ~50 MiB; the
              'parallel' class axis is also shared by 2 TensorCores.
    """
    try:
        phys = int(pltpu.get_tpu_info().vmem_capacity_bytes)
        if phys <= 0:
            phys = 64 << 20
    except Exception:  # conservative fallback if the query is unavailable
        phys = 64 << 20
    vmem_limit = min(int(phys * 0.78), 100 << 20)   # 128 MiB -> ~100 MiB, 64 MiB -> ~50 MiB
    tile_budget = int(vmem_limit * 0.80)            # headroom for Mosaic internal scratch
    num_cores = 2 if phys <= (64 << 20) else 1      # only v7x pairs 64 MiB VMEM with 2 TCs
    return vmem_limit, tile_budget, num_cores


def _vmem_need(t, D, B, w_itemsize, x_itemsize, out_itemsize):
    """Estimated VMEM bytes for a TILE_C = t class tile.

    Counts the double-buffered pipelined blocks (W tile, out tile, resident x,
    lane-padded (B,1)->(B,128) label block) plus in-kernel intermediates
    (f32 wn copy + its matmul-dtype cast, cosine/select temporaries)."""
    b8 = _round_up(B, 8)
    w_buf = 2 * t * D * w_itemsize
    out_buf = 2 * b8 * t * out_itemsize
    x_buf = 2 * b8 * D * x_itemsize
    lbl_buf = 2 * b8 * 128 * 4
    scratch = t * D * (4 + 2) + 4 * b8 * t * 4
    return w_buf + out_buf + x_buf + lbl_buf + scratch


def _pick_tile_c(C, D, B, budget_bytes, *, w_itemsize, x_itemsize, out_itemsize,
                 num_cores=1):
    """Pick the class-tile width (multiple of 128) maximizing streaming throughput
    under the VMEM budget.  Cost = (load-balanced grid steps) * TILE_C / DMA_eff.
    C is padded up to a multiple of the chosen tile by the wrapper, so there is
    never a fallback to a full-(C, D) block."""
    max_t = min(_round_up(C, 128), 16 * 1024)
    cands = [t for t in range(128, max_t + 1, 128)
             if _vmem_need(t, D, B, w_itemsize, x_itemsize, out_itemsize) <= budget_bytes]
    if not cands:
        cands = [128]  # smallest lane-dense tile; never the whole (C, D) array

    def cost(t):
        n_tiles = -(-C // t)
        n_sched = _round_up(n_tiles, num_cores)   # v7x: keep the 2 TCs balanced
        return (n_sched * t) / _dma_eff(t)

    return min(cands, key=cost)


def _arcface_kernel(xn_ref, w_ref, label_ref, out_ref, *, s, cos_m, sin_m, th, mm,
                    easy_margin, tile_c, mm_dtype):
    xn = xn_ref[...]                               # (B, D) pre-normalized, matmul dtype
    w = w_ref[...].astype(jnp.float32)             # (TILE_C, D) streamed weight tile
    lbl = label_ref[...]                           # (B, 1) int32, resident

    # F.normalize(w, p=2, dim=1): w / max(||w||, eps) == w * rsqrt(max(||w||^2, eps^2)).
    # Each W row is visited by exactly one grid step, so this is done once per row.
    eps = 1e-12
    wn = w * jax.lax.rsqrt(jnp.maximum(jnp.sum(w * w, axis=-1, keepdims=True), eps * eps))

    # cosine = xn @ wn^T: contract the last dim of both operands on the MXU
    # (no explicit transpose / relayout of the W tile requested).
    cosine = jax.lax.dot_general(
        xn, wn.astype(mm_dtype),
        dimension_numbers=(((1,), (1,)), ((), ())),
        preferred_element_type=jnp.float32)        # (B, TILE_C) f32

    # Margin math only at the label column.
    # NOTE: the iota MUST be offset by the tile base (j * TILE_C) so the margin
    # is applied to the correct global class column in every tile.
    base = pl.program_id(0) * tile_c
    class_idx = base + jax.lax.broadcasted_iota(jnp.int32, (1, tile_c), 1)
    is_target = class_idx == lbl                   # (B, TILE_C); lbl (B,1) broadcasts

    # Per-row target cosine via masked row-reduce (0 if the label is not in this tile,
    # in which case the delta below is never applied).
    cos_t = jnp.sum(jnp.where(is_target, cosine, 0.0), axis=-1, keepdims=True)  # (B, 1)
    sin_t = jnp.sqrt(jnp.clip(1.0 - cos_t * cos_t, 0.0, 1.0))
    phi_t = cos_t * cos_m - sin_t * sin_m
    if easy_margin:
        phi_t = jnp.where(cos_t > 0.0, phi_t, cos_t)
    else:
        phi_t = jnp.where(cos_t > th, phi_t, cos_t - mm)
    delta = phi_t - cos_t                          # (B, 1)

    # one_hot*phi + (1-one_hot)*cosine == cosine + one_hot*(phi - cosine)
    out = s * (cosine + jnp.where(is_target, delta, 0.0))
    out_ref[...] = out.astype(out_ref.dtype)


def arc_margin_product(x, weight, label, *, s=30.0, m=0.5, easy_margin=False,
                       tile_c=None, use_bf16_matmul=True, out_dtype=jnp.float32):
    """x: (B, in_features), weight: (out_features, in_features), label: (B,) int.
    Returns (B, out_features) logits in out_dtype."""
    B, D = x.shape
    C, D2 = weight.shape
    assert D == D2
    label2d = label.reshape(B, 1).astype(jnp.int32)

    mm_dtype = jnp.bfloat16 if use_bf16_matmul else jnp.float32

    # Hoisted x normalization (F.normalize(input)): computed once in the wrapper
    # instead of once per class tile inside the kernel.  Cast to the matmul dtype
    # so the resident x block is as small as possible.
    eps = 1e-12
    x32 = x.astype(jnp.float32)
    xn = x32 * jax.lax.rsqrt(
        jnp.maximum(jnp.sum(x32 * x32, axis=-1, keepdims=True), eps * eps))
    xn = xn.astype(mm_dtype)

    vmem_limit, tile_budget, num_cores = _vmem_plan()

    if tile_c is None:
        tile_c = _pick_tile_c(
            C, D, B, tile_budget,
            w_itemsize=jnp.dtype(weight.dtype).itemsize,
            x_itemsize=jnp.dtype(mm_dtype).itemsize,
            out_itemsize=jnp.dtype(out_dtype).itemsize,
            num_cores=num_cores)
    assert tile_c % 128 == 0 and tile_c >= 128, "tile_c must be a positive multiple of 128"

    # Pad the class dim up to a multiple of tile_c (zero rows normalize to zero
    # cosine and labels never point at them); slice the padded columns off at the end.
    n_tiles = -(-C // tile_c)
    C_pad = n_tiles * tile_c
    w_in = weight if C_pad == C else jnp.pad(weight, ((0, C_pad - C), (0, 0)))

    cos_m = math.cos(m)
    sin_m = math.sin(m)
    th = math.cos(math.pi - m)
    mm = math.sin(math.pi - m) * m

    kernel = functools.partial(
        _arcface_kernel, s=s, cos_m=cos_m, sin_m=sin_m, th=th, mm=mm,
        easy_margin=easy_margin, tile_c=tile_c, mm_dtype=mm_dtype)

    cost = pl.CostEstimate(
        flops=2 * B * C_pad * D,
        transcendentals=C_pad + B * n_tiles,   # per-row W rsqrt + per-tile target sqrt
        bytes_accessed=(xn.size * jnp.dtype(mm_dtype).itemsize
                        + w_in.size * jnp.dtype(w_in.dtype).itemsize
                        + B * 4
                        + B * C_pad * jnp.dtype(out_dtype).itemsize),
    )

    out = pl.pallas_call(
        kernel,
        out_shape=jax.ShapeDtypeStruct((B, C_pad), out_dtype),
        grid_spec=pltpu.PrefetchScalarGridSpec(
            num_scalar_prefetch=0,
            grid=(n_tiles,),
            in_specs=[
                pl.BlockSpec((B, D), lambda j: (0, 0)),        # xn: resident
                pl.BlockSpec((tile_c, D), lambda j: (j, 0)),   # W: streamed per tile
                pl.BlockSpec((B, 1), lambda j: (0, 0)),        # labels: resident
            ],
            out_specs=pl.BlockSpec((B, tile_c), lambda j: (0, j)),
        ),
        compiler_params=pltpu.CompilerParams(
            # class tiles are output-disjoint -> safe to shard across v7x's 2 TCs
            dimension_semantics=("parallel",),
            vmem_limit_bytes=vmem_limit,
        ),
        cost_estimate=cost,
    )(xn, w_in, label2d)

    if C_pad != C:
        out = out[:, :C]
    return out

    # TODO(synk): the `regular == 'Y'` exclusive-loss branch is dead by default in the
    # PyTorch module (`is 'Y'` with regular='N'); not implemented.


def _reference(x, weight, label, *, s=30.0, m=0.5, easy_margin=False):
    eps = 1e-12
    xn = x / jnp.maximum(jnp.linalg.norm(x, axis=1, keepdims=True), eps)
    wn = weight / jnp.maximum(jnp.linalg.norm(weight, axis=1, keepdims=True), eps)
    cosine = xn @ wn.T
    sine = jnp.sqrt(jnp.clip(1.0 - cosine ** 2, 0.0, 1.0))
    phi = cosine * math.cos(m) - sine * math.sin(m)
    th = math.cos(math.pi - m)
    mm = math.sin(math.pi - m) * m
    if easy_margin:
        phi = jnp.where(cosine > 0, phi, cosine)
    else:
        phi = jnp.where(cosine > th, phi, cosine - mm)
    one_hot = jax.nn.one_hot(label, weight.shape[0], dtype=jnp.float32)
    return (one_hot * phi + (1.0 - one_hot) * cosine) * s


if __name__ == "__main__":
    B, in_features, out_features = 8, 32, 512
    key = jax.random.PRNGKey(0)
    kx, kw, kl = jax.random.split(key, 3)

    x = jax.random.normal(kx, (B, in_features), dtype=jnp.float32)
    # xavier_uniform_ for weight (out_features, in_features)
    bound = math.sqrt(6.0 / (in_features + out_features))
    weight = jax.random.uniform(kw, (out_features, in_features),
                                minval=-bound, maxval=bound, dtype=jnp.float32)
    label = jax.random.randint(kl, (B,), 0, out_features, dtype=jnp.int32)

    ref = _reference(x, weight, label)
    ref_easy = _reference(x, weight, label, easy_margin=True)

    # Exact f32 MXU path, auto-picked tile.
    out = jax.block_until_ready(arc_margin_product(x, weight, label, use_bf16_matmul=False))
    assert out.shape == (B, out_features)
    assert jnp.allclose(out, ref, atol=1e-4, rtol=1e-4), "mismatch (auto tile, f32)"

    # Explicit multi-tile run (exercises the tile-offset iota / cross-tile label reduce).
    out_t = jax.block_until_ready(
        arc_margin_product(x, weight, label, tile_c=128, use_bf16_matmul=False))
    assert jnp.allclose(out_t, ref, atol=1e-4, rtol=1e-4), "mismatch (tiled, f32)"

    # easy_margin branch.
    out_e = jax.block_until_ready(
        arc_margin_product(x, weight, label, easy_margin=True, tile_c=128,
                           use_bf16_matmul=False))
    assert jnp.allclose(out_e, ref_easy, atol=1e-4, rtol=1e-4), "mismatch (easy_margin)"

    # Non-multiple-of-128 class count -> wrapper-side padding path.
    C2 = 500
    w2 = weight[:C2]
    lbl2 = label % C2
    ref2 = _reference(x, w2, lbl2)
    out2 = jax.block_until_ready(
        arc_margin_product(x, w2, lbl2, tile_c=128, use_bf16_matmul=False))
    assert out2.shape == (B, C2)
    assert jnp.allclose(out2, ref2, atol=1e-4, rtol=1e-4), "mismatch (padded C)"

    # Default fast path (bf16 MXU operands): looser tolerance -- bf16 operand rounding
    # perturbs cosine by ~1e-3 which is scaled by s=30.
    out_bf = jax.block_until_ready(arc_margin_product(x, weight, label))
    assert float(jnp.max(jnp.abs(out_bf - ref))) < 0.3, "mismatch (bf16 matmul)"

    # bf16 weight stream (halves the dominant C*D HBM read), upcast per tile for normalize.
    out_wbf = jax.block_until_ready(
        arc_margin_product(x, weight.astype(jnp.bfloat16), label))
    assert float(jnp.max(jnp.abs(out_wbf - ref))) < 0.3, "mismatch (bf16 weight stream)"

    print("KERNEL_OK")
</pallas_src>

<mosaic_0001>
module attributes {stable_mosaic.version = 11 : i64} {
  func.func @_arcface_kernel(%arg0: i32, %arg1: memref<8x32xf32, #tpu.memory_space<vmem>>, %arg2: memref<256x32xf32, #tpu.memory_space<vmem>>, %arg3: memref<8x1xi32, #tpu.memory_space<vmem>>, %arg4: memref<8x256xf32, #tpu.memory_space<vmem>>) attributes {dimension_semantics = [#tpu.dimension_semantics<parallel>], iteration_bounds = array<i64: 2>, scalar_prefetch = 0 : i64, scratch_operands = 0 : i64, tpu.core_type = #tpu.core_type<tc>, window_params = [{pipeline_mode = #tpu.pipeline_mode<synchronous>, transform_indices = @transform_0, window_bounds = array<i64: 8, 32>}, {transform_indices = @transform_1, window_bounds = array<i64: 256, 32>}, {pipeline_mode = #tpu.pipeline_mode<synchronous>, transform_indices = @transform_2, window_bounds = array<i64: 8, 1>}, {transform_indices = @transform_3, window_bounds = array<i64: 8, 256>}]} {
    %c0 = arith.constant 0 : index
    %c0_0 = arith.constant 0 : index
    %0 = vector.load %arg1[%c0, %c0_0] : memref<8x32xf32, #tpu.memory_space<vmem>>, vector<8x32xf32>
    %c0_1 = arith.constant 0 : index
    %c0_2 = arith.constant 0 : index
    %1 = vector.load %arg2[%c0_1, %c0_2] : memref<256x32xf32, #tpu.memory_space<vmem>>, vector<256x32xf32>
    %c0_3 = arith.constant 0 : index
    %c0_4 = arith.constant 0 : index
    %2 = vector.load %arg3[%c0_3, %c0_4] : memref<8x1xi32, #tpu.memory_space<vmem>>, vector<8x1xi32>
    %3 = arith.mulf %1, %1 : vector<256x32xf32>
    %cst = arith.constant dense<0.000000e+00> : vector<256xf32>
    %4 = vector.multi_reduction <add>, %3, %cst [1] : vector<256x32xf32> to vector<256xf32>
    %5 = vector.shape_cast %4 : vector<256xf32> to vector<256x1xf32>
    %cst_5 = arith.constant 1.000000e-24 : f32
    %6 = vector.broadcast %cst_5 : f32 to vector<256x1xf32>
    %7 = arith.maximumf %5, %6 : vector<256x1xf32>
    %8 = math.rsqrt %7 : vector<256x1xf32>
    %9 = vector.broadcast %8 : vector<256x1xf32> to vector<256x32xf32>
    %10 = arith.mulf %1, %9 : vector<256x32xf32>
    %cst_6 = arith.constant dense<0.000000e+00> : vector<8x256xf32>
    %11 = tpu.matmul %0, %10, %cst_6 {dimension_numbers = #tpu.dot_dimension_numbers<[1], [1], [0], [0], [0, 0, 1, 0], [], []>} : vector<8x32xf32>, vector<256x32xf32>, vector<8x256xf32> -> vector<8x256xf32>
    %c256_i32 = arith.constant 256 : i32
    %12 = arith.muli %arg0, %c256_i32 : i32
    %13 = tpu.iota {dimensions = array<i32: 1>} : vector<1x256xi32>
    %14 = vector.broadcast %12 : i32 to vector<1x256xi32>
    %15 = arith.addi %14, %13 : vector<1x256xi32>
    %16 = vector.broadcast %15 : vector<1x256xi32> to vector<8x256xi32>
    %17 = vector.broadcast %2 : vector<8x1xi32> to vector<8x256xi32>
    %18 = arith.cmpi eq, %16, %17 : vector<8x256xi32>
    %cst_7 = arith.constant 0.000000e+00 : f32
    %19 = vector.broadcast %cst_7 : f32 to vector<8x256xf32>
    %20 = arith.select %18, %11, %19 : vector<8x256xi1>, vector<8x256xf32>
    %cst_8 = arith.constant dense<0.000000e+00> : vector<8xf32>
    %21 = vector.multi_reduction <add>, %20, %cst_8 [1] : vector<8x256xf32> to vector<8xf32>
    %22 = vector.shape_cast %21 : vector<8xf32> to vector<8x1xf32>
    %23 = arith.mulf %22, %22 : vector<8x1xf32>
    %cst_9 = arith.constant 1.000000e+00 : f32
    %24 = vector.broadcast %cst_9 : f32 to vector<8x1xf32>
    %25 = arith.subf %24, %23 : vector<8x1xf32>
    %cst_10 = arith.constant 0.000000e+00 : f32
    %cst_11 = arith.constant 1.000000e+00 : f32
    %26 = vector.broadcast %cst_10 : f32 to vector<8x1xf32>
    %27 = arith.maximumf %26, %25 : vector<8x1xf32>
    %28 = vector.broadcast %cst_11 : f32 to vector<8x1xf32>
    %29 = arith.minimumf %28, %27 : vector<8x1xf32>
    %30 = math.sqrt %29 : vector<8x1xf32>
    %cst_12 = arith.constant 0.87758255 : f32
    %31 = vector.broadcast %cst_12 : f32 to vector<8x1xf32>
    %32 = arith.mulf %22, %31 : vector<8x1xf32>
    %cst_13 = arith.constant 0.47942555 : f32
    %33 = vector.broadcast %cst_13 : f32 to vector<8x1xf32>
    %34 = arith.mulf %30, %33 : vector<8x1xf32>
    %35 = arith.subf %32, %34 : vector<8x1xf32>
    %cst_14 = arith.constant -0.87758255 : f32
    %36 = vector.broadcast %cst_14 : f32 to vector<8x1xf32>
    %37 = arith.cmpf ogt, %22, %36 : vector<8x1xf32>
    %cst_15 = arith.constant 0.239712775 : f32
    %38 = vector.broadcast %cst_15 : f32 to vector<8x1xf32>
    %39 = arith.subf %22, %38 : vector<8x1xf32>
    %40 = arith.select %37, %35, %39 : vector<8x1xi1>, vector<8x1xf32>
    %41 = arith.subf %40, %22 : vector<8x1xf32>
    %cst_16 = arith.constant 0.000000e+00 : f32
    %42 = vector.shape_cast %41 : vector<8x1xf32> to vector<8x1xf32>
    %43 = vector.broadcast %42 : vector<8x1xf32> to vector<8x256xf32>
    %44 = vector.broadcast %cst_16 : f32 to vector<8x256xf32>
    %45 = arith.select %18, %43, %44 : vector<8x256xi1>, vector<8x256xf32>
    %46 = arith.addf %11, %45 : vector<8x256xf32>
    %cst_17 = arith.constant 3.000000e+01 : f32
    %47 = vector.broadcast %cst_17 : f32 to vector<8x256xf32>
    %48 = arith.mulf %47, %46 : vector<8x256xf32>
    %c0_18 = arith.constant 0 : index
    %c0_19 = arith.constant 0 : index
    %49 = vector.load %arg4[%c0_18, %c0_19] : memref<8x256xf32, #tpu.memory_space<vmem>>, vector<8x256xf32>
    tpu.vector_store %arg4[%c0_18, %c0_19], %48 {strides = array<i32>} : memref<8x256xf32, #tpu.memory_space<vmem>>, vector<8x256xf32>,
    return
  }
  func.func @transform_0(%arg0: i32) -> (i32, i32) {
    %c0_i32 = arith.constant 0 : i32
    %c0_i32_0 = arith.constant 0 : i32
    %c0_i32_1 = arith.constant 0 : i32
    return %c0_i32, %c0_i32_0 : i32, i32
  }
  func.func @transform_1(%arg0: i32) -> (i32, i32) {
    %c0_i32 = arith.constant 0 : i32
    %c0_i32_0 = arith.constant 0 : i32
    return %arg0, %c0_i32 : i32, i32
  }
  func.func @transform_2(%arg0: i32) -> (i32, i32) {
    %c0_i32 = arith.constant 0 : i32
    %c0_i32_0 = arith.constant 0 : i32
    %c0_i32_1 = arith.constant 0 : i32
    return %c0_i32, %c0_i32_0 : i32, i32
  }
  func.func @transform_3(%arg0: i32) -> (i32, i32) {
    %c0_i32 = arith.constant 0 : i32
    %c0_i32_0 = arith.constant 0 : i32
    return %c0_i32, %arg0 : i32, i32
  }
}

</mosaic_0001>

<bundles_post_ra>
// kernel: tpu_custom_call.1
= control target key start
LH: loop header
LB: loop body
LE: loop exit
PB: predicated region body
PF: predicated region fallthrough
CT: control target
= control target key end

     0   :  { %8 = vsyncpa [#allocation3], 0  ;;  %s1424_s0 = inlined_call_operand.vmem [shape: f32[8,32], index: 0, kind: input, shape index: {}]   ;;  %s1425_s1 = inlined_call_operand.vmem [shape: f32[512,32], index: 1, kind: input, shape index: {}]   ;;  %s1426_s2 = inlined_call_operand.vmem [shape: s32[8,1], index: 2, kind: input, shape index: {}]   ;;  %s1427_s3 = inlined_call_operand.hbm [shape: f32[8,512], index: 3, kind: output, shape index: {}]  }
   0x1   :  { %10 = vsyncpa [#allocation3 + $0x1], 0  ;;  %s1041_s12 = smov 0   ;;  %s1043_s13 = smov 0  }
   0x2   :  { %s1045_s14 = smov 0   ;;  %s1047_s15 = smov 0  }
   0x3 LB: > { %s1062_s16 = sadd.s32 4294967295, %s1017_s15   ;;  %s718_s17 = sadd.s32 4294967294, %s1017_s15   ;;  %s1017_s15 = sphi %s1047_s15, %s1435_s15   ;;  %s1013_s14 = sphi %s1045_s14, %s1434_s14   ;;  %s1009_s13 = sphi %s1043_s13, %s1433_s13   ;;  %s1005_s12 = sphi %s1041_s12, %s1432_s12  }
   0x4   : > { %s1066_s18 = sadd.s32 1, %s1017_s15   ;;  %s91_s19 = sadd.s32 1, %s1013_s14 }
   0x5   : > { %s88_s20 = ssub.s32 %s1017_s15, %s1066_s18  ;;  %p101_p0 = scmp.ne.s32.totalorder %s1013_s14, %s1009_s13 }
   0x6   : > { %p89_p1 = scmp.eq.s32.totalorder %s88_s20, 0  ;;  %p102_p2 = scmp.eq.s32.totalorder %s1062_s16, 1 }
   0x7   : > { %p107_p3 = scmp.ne.s32.totalorder %s1009_s13, %s1005_s12  ;;  %p108_p4 = scmp.eq.s32.totalorder %s718_s17, 1 }
   0x8   : > { %s1077_s21 = scalar_select %p89_p1, %s1013_s14, %s91_s19  }
   0x9   : > { %p1079_p5 = por %p102_p2, %p101_p0  ;;  %p1083_p6 = por %p108_p4, %p107_p3 }
   0xa   : > { %p721_p7 = scmp.ge.s32.totalorder %s1017_s15, 1  ;;  %p141_p8 = scmp.lt.s32.totalorder %s1017_s15, 3 }
   0xc   : > { %p142_p9 = pnand %p721_p7, %p141_p8 }
   0xd   : > { %s723_s24 = sshll.u32 (!%p142_p9), %s1062_s16, 5  ;;  %vm238_vm0 = vcmask (!%p142_p9), 261120   ;;  %s758_s6 = sshll.u32 (!%p142_p9), %s1062_s16, 8 }
   0xe   : > { %145 = sbr.rel (%p142_p9) target bundleno = 662 (0x296), region = 32  ;;  %p166_p10 = scmp.lt.s32.totalorder (!%p142_p9), %s723_s24, 63  ;;  %vm1301_vm1 = vmpackc.low (!%p142_p9), %vm238_vm0, %vm238_vm0 }
   0xf   : > { %s162_s7 = sand.u32 (!%p142_p9), 1, %s1009_s13   ;;  %s1382_s19 = scalar_lea.hbm (!%p142_p9), %s1427_s3, %s758_s6 }
  0x10   : > { %s722_s8 = sshll.u32 (!%p142_p9), %s162_s7, 4  ;;  %s645_s20 = scalar_lea.sflag (!%p142_p9), [#allocation3], %s162_s7 }
  0x11   : > { %s164_s9 = scalar_lea.vmem (!%p142_p9), [#allocation2], %s722_s8  ;;  %s1020_s16 = smov (!%p142_p9), [#allocation2]  }
  0x12   : > { %s659_s10 = sshll.u32 (!%p142_p9), %s164_s9, 4  ;;  %s1384_s10 = int_to_ptr.vmem [resolvable:$true] %s659_s10 }
  0x15   : > { %s1437_s24 = smov (!%p166_p10, %s723_s24), 63 }
  0x16   : > { %s724_s25 = sshll.u32 %s1437_s24, 3  ;;  %s955_s24 = scalar_lea.vmem %s1384_s10, 256 }
  0x17   : > { %s1093_s28 = scalar_lea.vmem %s1425_s1, %s724_s25  ;;  %p956_p11 = scmp.ne.s32.totalorder %s1384_s10, %s955_s24 }
  0x18   : > { %v1096_v0 = vld [vmem:[%s1093_s28 + $0x80] sm:$0xff]  ;;  %v1102_v2 = vld [vmem:[%s1093_s28 + $0x88] sm:$0xff]  ;;  %v1116_v8 = vld [vmem:[%s1093_s28 + $0x90] sm:$0xff]  ;;  %s959_s25 = sshll.u32 %s1020_s16, 4  ;;  %s960_s25 = int_to_ptr.vmem [resolvable:$false] %s959_s25 }
  0x19   : > { %v1099_v1 = vld [vmem:[%s1093_s28] sm:$0xff]  ;;  %v222_v3 = vmul.f32 %v1096_v0, %v1096_v0  ;;  %v223_v5 = vmul.f32 %v1102_v2, %v1102_v2  ;;  %v1111_v6 = vld [vmem:[%s1093_s28 + $0x8] sm:$0xff]  ;;  %v1119_v9 = vld [vmem:[%s1093_s28 + $0x98] sm:$0xff]  ;;  %v224_v14 = vmul.f32 %v1116_v8, %v1116_v8  ;;  %p957_p12 = pnand %p956_p11, %p1079_p5  ;;  %s961_s26 = scalar_lea.vmem %s960_s25, 512 }
  0x1a   : > { %v206_v4 = vmul.f32 %v1099_v1, %v1099_v1  ;;  %v207_v7 = vmul.f32 %v1111_v6, %v1111_v6  ;;  %v225_v15 = vmul.f32 %v1119_v9, %v1119_v9  ;;  %v1130_v16 = vld [vmem:[%s1093_s28 + $0x10] sm:$0xff]  ;;  %v1133_v17 = vld [vmem:[%s1093_s28 + $0x18] sm:$0xff]  ;;  %v1142_v22 = vld [vmem:[%s1093_s28 + $0xa0] sm:$0xff]  ;;  %p962_p0 = scmp.lt.s32.totalorder %s1384_s10, %s960_s25  ;;  %p963_p1 = scmp.lt.s32.totalorder %s961_s26, %s955_s24 }
  0x1b   : > { %v287_v10 = vsel %vm238_vm0, %v222_v3, 0.0  ;;  %v290_v12 = vsel %vm238_vm0, %v223_v5, 0.0  ;;  %v293_v18 = vsel %vm238_vm0, %v224_v14, 0.0  ;;  %v208_v20 = vmul.f32 %v1130_v16, %v1130_v16  ;;  %v1145_v23 = vld [vmem:[%s1093_s28 + $0xa8] sm:$0xff]  ;;  %v1154_v28 = vld [vmem:[%s1093_s28 + $0x20] sm:$0xff]  ;;  %v1166_v34 = vld [vmem:[%s1093_s28 + $0xb0] sm:$0xff]  ;;  %p958_p13 = pneg %p957_p12 }
  0x1c   : > { %v239_v11 = vsel %vm238_vm0, %v206_v4, 0.0  ;;  %288 = vadd.xlane.f32.xlu0 %v287_v10  ;;  %v242_v13 = vsel %vm238_vm0, %v207_v7, 0.0  ;;  %v296_v19 = vsel %vm238_vm0, %v225_v15, 0.0  ;;  %v209_v21 = vmul.f32 %v1133_v17, %v1133_v17  ;;  %v1157_v29 = vld [vmem:[%s1093_s28 + $0x28] sm:$0xff]  ;;  %v1169_v35 = vld [vmem:[%s1093_s28 + $0xb8] sm:$0xff]  ;;  %v1178_v40 = vld [vmem:[%s1093_s28 + $0x30] sm:$0xff]  ;;  %p964_p2 = por %p963_p1, %p962_p0 }
  0x1d   : > { %240 = vadd.xlane.f32.xlu1 %v239_v11  ;;  %v245_v24 = vsel %vm238_vm0, %v208_v20, 0.0  ;;  %v226_v26 = vmul.f32 %v1142_v22, %v1142_v22  ;;  %v227_v27 = vmul.f32 %v1145_v23, %v1145_v23  ;;  %v210_v32 = vmul.f32 %v1154_v28, %v1154_v28  ;;  %v1181_v41 = vld [vmem:[%s1093_s28 + $0x38] sm:$0xff]  ;;  %v1190_v46 = vld [vmem:[%s1093_s28 + $0xc0] sm:$0xff]  ;;  %v1193_v47 = vld [vmem:[%s1093_s28 + $0xc8] sm:$0xff] }
  0x1e   : > { %v248_v25 = vsel %vm238_vm0, %v209_v21, 0.0  ;;  %v211_v33 = vmul.f32 %v1157_v29, %v1157_v29  ;;  %v228_v38 = vmul.f32 %v1166_v34, %v1166_v34  ;;  %v229_v39 = vmul.f32 %v1169_v35, %v1169_v35  ;;  %v1202_v52 = vld [vmem:[%s1093_s28 + $0x40] sm:$0xff]  ;;  %v1205_v53 = vld [vmem:[%s1093_s28 + $0x48] sm:$0xff]  ;;  %v1214_v58 = vld [vmem:[%s1093_s28 + $0xd0] sm:$0xff]  ;;  %p965_p3 = pnand %p964_p2, %p958_p13 }
  0x1f   : > { %v299_v30 = vsel %vm238_vm0, %v226_v26, 0.0  ;;  %v302_v31 = vsel %vm238_vm0, %v227_v27, 0.0  ;;  %v251_v36 = vsel %vm238_vm0, %v210_v32, 0.0  ;;  %v212_v44 = vmul.f32 %v1178_v40, %v1178_v40  ;;  %v1217_v59 = vld [vmem:[%s1093_s28 + $0xd8] sm:$0xff]  ;;  %v1226_v3 = vld [vmem:[%s1093_s28 + $0x50] sm:$0xff]  ;;  %v1250_v20 = vld [vmem:[%s1093_s28 + $0x60] sm:$0xff] }
  0x20   : > { %291 = vadd.xlane.f32.xlu0 %v290_v12  ;;  %v254_v37 = vsel %vm238_vm0, %v211_v33, 0.0  ;;  %v305_v42 = vsel %vm238_vm0, %v228_v38, 0.0  ;;  %v308_v43 = vsel %vm238_vm0, %v229_v39, 0.0  ;;  %v213_v45 = vmul.f32 %v1181_v41, %v1181_v41  ;;  %v1229_v4 = vld [vmem:[%s1093_s28 + $0x58] sm:$0xff]  ;;  %v1238_v12 = vld [vmem:[%s1093_s28 + $0xe0] sm:$0xff]  ;;  %v1253_v21 = vld [vmem:[%s1093_s28 + $0x68] sm:$0xff] }
  0x21   : > { %243 = vadd.xlane.f32.xlu1 %v242_v13  ;;  %v257_v48 = vsel %vm238_vm0, %v212_v44, 0.0  ;;  %v230_v50 = vmul.f32 %v1190_v46, %v1190_v46  ;;  %v231_v51 = vmul.f32 %v1193_v47, %v1193_v47  ;;  %v214_v56 = vmul.f32 %v1202_v52, %v1202_v52  ;;  %v1241_v13 = vld [vmem:[%s1093_s28 + $0xe8] sm:$0xff]  ;;  %v1274_v38 = vld [vmem:[%s1093_s28 + $0x70] sm:$0xff]  ;;  %v1277_v39 = vld [vmem:[%s1093_s28 + $0x78] sm:$0xff] }
  0x22   : > { %v260_v49 = vsel %vm238_vm0, %v213_v45, 0.0  ;;  %v215_v57 = vmul.f32 %v1205_v53, %v1205_v53  ;;  %v232_v62 = vmul.f32 %v1214_v58, %v1214_v58  ;;  %v233_v63 = vmul.f32 %v1217_v59, %v1217_v59 }
  0x23   : > { %v311_v54 = vsel %vm238_vm0, %v230_v50, 0.0  ;;  %v314_v55 = vsel %vm238_vm0, %v231_v51, 0.0  ;;  %v263_v60 = vsel %vm238_vm0, %v214_v56, 0.0  ;;  %v216_v10 = vmul.f32 %v1226_v3, %v1226_v3  ;;  %v1290_v50 = vld [vmem:[%s1424_s0] sm:$0xff] }
  0x24   : > { %294 = vadd.xlane.f32.xlu0 %v293_v18  ;;  %v266_v61 = vsel %vm238_vm0, %v215_v57, 0.0  ;;  %v317_v5 = vsel %vm238_vm0, %v232_v62, 0.0  ;;  %v320_v7 = vsel %vm238_vm0, %v233_v63, 0.0  ;;  %v217_v11 = vmul.f32 %v1229_v4, %v1229_v4  ;;  %798 = vmatprep.mubr.msk.f32.mxu0 %vm238_vm0, %v1290_v50  ;;  %v205_v51 = vld [vmem:[%s1426_s2] sm:$0xff] }
  0x25   : > { %297 = vadd.xlane.f32.xlu1 %v296_v19  ;;  %v269_v14 = vsel %vm238_vm0, %v216_v10, 0.0  ;;  %v234_v18 = vmul.f32 %v1238_v12, %v1238_v12  ;;  %v235_v19 = vmul.f32 %v1241_v13, %v1241_v13  ;;  %v218_v26 = vmul.f32 %v1250_v20, %v1250_v20 }
  0x26   : > { %v272_v15 = vsel %vm238_vm0, %v217_v11, 0.0  ;;  %v219_v27 = vmul.f32 %v1253_v21, %v1253_v21  ;;  %v220_v44 = vmul.f32 %v1274_v38, %v1274_v38  ;;  %v221_v45 = vmul.f32 %v1277_v39, %v1277_v39 }
  0x27   : > { %v275_v32 = vsel %vm238_vm0, %v218_v26, 0.0 }
  0x28   : > { %246 = vadd.xlane.f32.xlu0 %v245_v24  ;;  %v323_v24 = vsel %vm238_vm0, %v234_v18, 0.0  ;;  %v278_v33 = vsel %vm238_vm0, %v219_v27, 0.0 }
  0x29   : > { %249 = vadd.xlane.f32.xlu1 %v248_v25  ;;  %v326_v25 = vsel %vm238_vm0, %v235_v19, 0.0 }
  0x2c   : > { %300 = vadd.xlane.f32.xlu0 %v299_v30  ;;  %v1262_v30 = vld [vmem:[%s1093_s28 + $0xf0] sm:$0xff] }
  0x2d   : > { %303 = vadd.xlane.f32.xlu1 %v302_v31  ;;  %v1265_v31 = vld [vmem:[%s1093_s28 + $0xf8] sm:$0xff] }
  0x30   : > { %252 = vadd.xlane.f32.xlu0 %v251_v36  ;;  %v236_v36 = vmul.f32 %v1262_v30, %v1262_v30 }
  0x31   : > { %255 = vadd.xlane.f32.xlu1 %v254_v37  ;;  %v237_v37 = vmul.f32 %v1265_v31, %v1265_v31 }
  0x34   : > { %306 = vadd.xlane.f32.xlu0 %v305_v42  ;;  %v329_v42 = vsel %vm238_vm0, %v236_v36, 0.0 }
  0x35   : > { %309 = vadd.xlane.f32.xlu1 %v308_v43  ;;  %v332_v43 = vsel %vm238_vm0, %v237_v37, 0.0 }
  0x38   : > { %258 = vadd.xlane.f32.xlu0 %v257_v48  ;;  %v281_v48 = vsel %vm238_vm0, %v220_v44, 0.0 }
  0x39   : > { %261 = vadd.xlane.f32.xlu1 %v260_v49  ;;  %v284_v49 = vsel %vm238_vm0, %v221_v45, 0.0 }
  0x3c   : > { %312 = vadd.xlane.f32.xlu0 %v311_v54  ;;  %v1019_v54 = vmov 0  }
  0x3d   : > { %315 = vadd.xlane.f32.xlu1 %v314_v55  ;;  %888 = vset.pattern.permute.xlu0 %v1019_v54 }
  0x40   : > { %264 = vadd.xlane.f32.xlu0 %v263_v60 }
  0x41   : > { %267 = vadd.xlane.f32.xlu1 %v266_v61 }
  0x44   : > { %318 = vadd.xlane.f32.xlu0 %v317_v5 }
  0x45   : > { %321 = vadd.xlane.f32.xlu1 %v320_v7 }
  0x48   : > { %270 = vadd.xlane.f32.xlu0 %v269_v14 }
  0x49   : > { %273 = vadd.xlane.f32.xlu1 %v272_v15 }
  0x4c   : > { %324 = vadd.xlane.f32.xlu0 %v323_v24 }
  0x4d   : > { %327 = vadd.xlane.f32.xlu1 %v326_v25 }
  0x50   : > { %276 = vadd.xlane.f32.xlu0 %v275_v32 }
  0x51   : > { %279 = vadd.xlane.f32.xlu1 %v278_v33 }
  0x54   : > { %330 = vadd.xlane.f32.xlu0 %v329_v42 }
  0x55   : > { %333 = vadd.xlane.f32.xlu1 %v332_v43 }
  0x58   : > { %282 = vadd.xlane.f32.xlu0 %v281_v48 }
  0x59   : > { %285 = vadd.xlane.f32.xlu1 %v284_v49 }
  0x6e   : > { %609 = vperm.xlu0 %888, %v205_v51  }
  0xa9   : > { %v289_v55 = vpop.xlane.xlu0 %288 }
  0xaa   : > { %v241_v56 = vpop.xlane.xlu1 %240  ;;  %v351_v57 = vmax.f32 %v289_v55, 1e-24 }
  0xab   : > { %v335_v60 = vmax.f32 %v241_v56, 1e-24 }
  0xac   : > { %889 = vrsqrt.f32 %v351_v57 }
  0xad   : > { %v292_v61 = vpop.xlane.xlu0 %291  ;;  %891 = vrsqrt.f32 %v335_v60 }
  0xae   : > { %v244_v62 = vpop.xlane.xlu1 %243  ;;  %v352_v63 = vmax.f32 %v292_v61, 1e-24 }
  0xaf   : > { %v336_v5 = vmax.f32 %v244_v62, 1e-24 }
  0xb0   : > { %893 = vrsqrt.f32 %v352_v63 }
  0xb1   : > { %895 = vrsqrt.f32 %v336_v5  ;;  %v295_v7 = vpop.xlane.xlu0 %294 }
  0xb2   : > { %v298_v10 = vpop.xlane.xlu1 %297  ;;  %v353_v11 = vmax.f32 %v295_v7, 1e-24 }
  0xb3   : > { %v354_v14 = vmax.f32 %v298_v10, 1e-24 }
  0xb4   : > { %897 = vrsqrt.f32 %v353_v11 }
  0xb5   : > { %899 = vrsqrt.f32 %v354_v14  ;;  %v247_v15 = vpop.xlane.xlu0 %246 }
  0xb6   : > { %v250_v18 = vpop.xlane.xlu1 %249  ;;  %v337_v19 = vmax.f32 %v247_v15, 1e-24  ;;  %v890_v25 = vpop.eup %889 }
  0xb7   : > { %v338_v24 = vmax.f32 %v250_v18, 1e-24  ;;  %v892_v26 = vpop.eup %891  ;;  %v415_v43 = vmul.f32 %v890_v25, %v1096_v0 }
  0xb8   : > { %901 = vrsqrt.f32 %v337_v19  ;;  %v399_v48 = vmul.f32 %v892_v26, %v1099_v1 }
  0xb9   : > { %903 = vrsqrt.f32 %v338_v24  ;;  %v301_v27 = vpop.xlane.xlu0 %300 }
  0xba   : > { %v304_v32 = vpop.xlane.xlu1 %303  ;;  %v894_v33 = vpop.eup %893  ;;  %v355_v36 = vmax.f32 %v301_v27, 1e-24 }
  0xbb   : > { %v356_v37 = vmax.f32 %v304_v32, 1e-24  ;;  %v896_v42 = vpop.eup %895  ;;  %v416_v44 = vmul.f32 %v894_v33, %v1102_v2 }
  0xbc   : > { %905 = vrsqrt.f32 %v355_v36  ;;  %v400_v49 = vmul.f32 %v896_v42, %v1111_v6 }
  0xbd   : > { %907 = vrsqrt.f32 %v356_v37  ;;  %v253_v51 = vpop.xlane.xlu0 %252  ;;  %v800_v55 = vpack.c.bf16 %v416_v44, %v415_v43 }
  0xbe   : > { %v256_v54 = vpop.xlane.xlu1 %255  ;;  %v898_v56 = vpop.eup %897  ;;  %v339_v57 = vmax.f32 %v253_v51, 1e-24  ;;  %v803_v60 = vpack.c.bf16 %v400_v49, %v399_v48 }
  0xbf   : > { %v340_v0 = vmax.f32 %v256_v54, 1e-24  ;;  %v900_v2 = vpop.eup %899  ;;  %802 = vmatprep.subr.msk.bf16.mxu0 %vm1301_vm1, %v800_v55  ;;  %v417_v61 = vmul.f32 %v898_v56, %v1116_v8 }
  0xc0   : > { %909 = vrsqrt.f32 %v339_v57  ;;  %805 = vmatpush3.bf16.xpose.msk.msra.mxu0 %vm1301_vm1, %v803_v60  ;;  %v418_v1 = vmul.f32 %v900_v2, %v1119_v9 }
  0xc1   : > { %911 = vrsqrt.f32 %v340_v0  ;;  %v307_v6 = vpop.xlane.xlu0 %306 }
  0xc2   : > { %v310_v62 = vpop.xlane.xlu1 %309  ;;  %v902_v63 = vpop.eup %901  ;;  %v357_v5 = vmax.f32 %v307_v6, 1e-24  ;;  %v806_v10 = vpack.c.bf16 %v418_v1, %v417_v61 }
  0xc3   : > { %v358_v7 = vmax.f32 %v310_v62, 1e-24  ;;  %v904_v11 = vpop.eup %903  ;;  %v401_v14 = vmul.f32 %v902_v63, %v1130_v16 }
  0xc4   : > { %913 = vrsqrt.f32 %v357_v5  ;;  %808 = vmatprep.subr.msk.bf16.mxu0 %vm1301_vm1, %v806_v10  ;;  %v402_v8 = vmul.f32 %v904_v11, %v1133_v17 }
  0xc5   : > { %915 = vrsqrt.f32 %v358_v7  ;;  %v259_v15 = vpop.xlane.xlu0 %258 }
  0xc6   : > { %v262_v18 = vpop.xlane.xlu1 %261  ;;  %v906_v9 = vpop.eup %905  ;;  %v341_v19 = vmax.f32 %v259_v15, 1e-24  ;;  %v809_v25 = vpack.c.bf16 %v402_v8, %v401_v14 }
  0xc7   : > { %v342_v24 = vmax.f32 %v262_v18, 1e-24  ;;  %v908_v26 = vpop.eup %907  ;;  %v419_v27 = vmul.f32 %v906_v9, %v1142_v22 }
  0xc8   : > { %917 = vrsqrt.f32 %v341_v19  ;;  %811 = vmatpush3.bf16.xpose.msk.msra.mxu0 %vm1301_vm1, %v809_v25  ;;  %v420_v16 = vmul.f32 %v908_v26, %v1145_v23 }
  0xc9   : > { %919 = vrsqrt.f32 %v342_v24  ;;  %v313_v32 = vpop.xlane.xlu0 %312 }
  0xca   : > { %v316_v33 = vpop.xlane.xlu1 %315  ;;  %v910_v17 = vpop.eup %909  ;;  %v359_v36 = vmax.f32 %v313_v32, 1e-24  ;;  %v812_v42 = vpack.c.bf16 %v420_v16, %v419_v27 }
  0xcb   : > { %v360_v37 = vmax.f32 %v316_v33, 1e-24  ;;  %v912_v43 = vpop.eup %911  ;;  %v403_v44 = vmul.f32 %v910_v17, %v1154_v28 }
  0xcc   : > { %921 = vrsqrt.f32 %v359_v36  ;;  %814 = vmatprep.subr.msk.bf16.mxu0 %vm1301_vm1, %v812_v42  ;;  %v404_v22 = vmul.f32 %v912_v43, %v1157_v29 }
  0xcd   : > { %923 = vrsqrt.f32 %v360_v37  ;;  %v265_v48 = vpop.xlane.xlu0 %264 }
  0xce   : > { %v268_v49 = vpop.xlane.xlu1 %267  ;;  %v914_v23 = vpop.eup %913  ;;  %v343_v51 = vmax.f32 %v265_v48, 1e-24  ;;  %v815_v55 = vpack.c.bf16 %v404_v22, %v403_v44 }
  0xcf   : > { %v344_v54 = vmax.f32 %v268_v49, 1e-24  ;;  %v916_v56 = vpop.eup %915  ;;  %v421_v57 = vmul.f32 %v914_v23, %v1166_v34 }
  0xd0   : > { %925 = vrsqrt.f32 %v343_v51  ;;  %817 = vmatpush3.bf16.xpose.msk.msra.mxu0 %vm1301_vm1, %v815_v55  ;;  %v422_v28 = vmul.f32 %v916_v56, %v1169_v35 }
  0xd1   : > { %927 = vrsqrt.f32 %v344_v54  ;;  %v319_v0 = vpop.xlane.xlu0 %318 }
  0xd2   : > { %v322_v60 = vpop.xlane.xlu1 %321  ;;  %v918_v29 = vpop.eup %917  ;;  %v361_v2 = vmax.f32 %v319_v0, 1e-24  ;;  %v818_v1 = vpack.c.bf16 %v422_v28, %v421_v57 }
  0xd3   : > { %v362_v61 = vmax.f32 %v322_v60, 1e-24  ;;  %v920_v6 = vpop.eup %919  ;;  %v405_v62 = vmul.f32 %v918_v29, %v1178_v40 }
  0xd4   : > { %929 = vrsqrt.f32 %v361_v2  ;;  %820 = vmatprep.subr.msk.bf16.mxu0 %vm1301_vm1, %v818_v1  ;;  %v406_v34 = vmul.f32 %v920_v6, %v1181_v41 }
  0xd5   : > { %931 = vrsqrt.f32 %v362_v61  ;;  %v271_v63 = vpop.xlane.xlu0 %270 }
  0xd6   : > { %v274_v5 = vpop.xlane.xlu1 %273  ;;  %v922_v35 = vpop.eup %921  ;;  %v345_v7 = vmax.f32 %v271_v63, 1e-24  ;;  %v821_v11 = vpack.c.bf16 %v406_v34, %v405_v62 }
  0xd7   : > { %v346_v10 = vmax.f32 %v274_v5, 1e-24  ;;  %v924_v14 = vpop.eup %923  ;;  %v423_v8 = vmul.f32 %v922_v35, %v1190_v46 }
  0xd8   : > { %933 = vrsqrt.f32 %v345_v7  ;;  %823 = vmatpush3.bf16.xpose.msk.msra.mxu0 %vm1301_vm1, %v821_v11  ;;  %v424_v40 = vmul.f32 %v924_v14, %v1193_v47 }
  0xd9   : > { %935 = vrsqrt.f32 %v346_v10  ;;  %v325_v15 = vpop.xlane.xlu0 %324  ;;  %v605_v10 = vstv %s758_s6 }
  0xda   : > { %v328_v18 = vpop.xlane.xlu1 %327  ;;  %v926_v41 = vpop.eup %925  ;;  %v363_v9 = vmax.f32 %v325_v15, 1e-24  ;;  %v824_v24 = vpack.c.bf16 %v424_v40, %v423_v8 }
  0xdb   : > { %v364_v19 = vmax.f32 %v328_v18, 1e-24  ;;  %v928_v25 = vpop.eup %927  ;;  %v407_v26 = vmul.f32 %v926_v41, %v1202_v52 }
  0xdc   : > { %937 = vrsqrt.f32 %v363_v9  ;;  %826 = vmatprep.subr.msk.bf16.mxu0 %vm1301_vm1, %v824_v24  ;;  %v408_v46 = vmul.f32 %v928_v25, %v1205_v53 }
  0xdd   : > { %939 = vrsqrt.f32 %v364_v19  ;;  %v277_v27 = vpop.xlane.xlu0 %276 }
  0xde   : > { %v280_v16 = vpop.xlane.xlu1 %279  ;;  %v930_v47 = vpop.eup %929  ;;  %v347_v32 = vmax.f32 %v277_v27, 1e-24  ;;  %v827_v17 = vpack.c.bf16 %v408_v46, %v407_v26 }
  0xdf   : > { %v348_v33 = vmax.f32 %v280_v16, 1e-24  ;;  %v932_v36 = vpop.eup %931  ;;  %v425_v37 = vmul.f32 %v930_v47, %v1214_v58 }
  0xe0   : > { %941 = vrsqrt.f32 %v347_v32  ;;  %829 = vmatpush3.bf16.xpose.msk.msra.mxu0 %vm1301_vm1, %v827_v17  ;;  %v426_v52 = vmul.f32 %v932_v36, %v1217_v59 }
  0xe1   : > { %943 = vrsqrt.f32 %v348_v33  ;;  %v331_v42 = vpop.xlane.xlu0 %330 }
  0xe2   : > { %v334_v43 = vpop.xlane.xlu1 %333  ;;  %v934_v53 = vpop.eup %933  ;;  %v365_v44 = vmax.f32 %v331_v42, 1e-24  ;;  %v830_v48 = vpack.c.bf16 %v426_v52, %v425_v37 }
  0xe3   : > { %v366_v22 = vmax.f32 %v334_v43, 1e-24  ;;  %v936_v49 = vpop.eup %935  ;;  %v409_v23 = vmul.f32 %v934_v53, %v1226_v3 }
  0xe4   : > { %945 = vrsqrt.f32 %v365_v44  ;;  %832 = vmatprep.subr.msk.bf16.mxu0 %vm1301_vm1, %v830_v48  ;;  %v410_v58 = vmul.f32 %v936_v49, %v1229_v4 }
  0xe5   : > { %947 = vrsqrt.f32 %v366_v22  ;;  %v283_v51 = vpop.xlane.xlu0 %282 }
  0xe6   : > { %v286_v54 = vpop.xlane.xlu1 %285  ;;  %v938_v59 = vpop.eup %937  ;;  %v349_v55 = vmax.f32 %v283_v51, 1e-24  ;;  %v833_v57 = vpack.c.bf16 %v410_v58, %v409_v23 }
  0xe7   : > { %v350_v56 = vmax.f32 %v286_v54, 1e-24  ;;  %v940_v28 = vpop.eup %939  ;;  %v427_v0 = vmul.f32 %v938_v59, %v1238_v12 }
  0xe8   : > { %949 = vrsqrt.f32 %v349_v55  ;;  %835 = vmatpush3.bf16.xpose.msk.msra.mxu0 %vm1301_vm1, %v833_v57  ;;  %v428_v3 = vmul.f32 %v940_v28, %v1241_v13 }
  0xe9   : > { %951 = vrsqrt.f32 %v350_v56 }
  0xea   : > { %v942_v60 = vpop.eup %941  ;;  %v836_v29 = vpack.c.bf16 %v428_v3, %v427_v0 }
  0xeb   : > { %v944_v4 = vpop.eup %943  ;;  %v411_v2 = vmul.f32 %v942_v60, %v1250_v20 }
  0xec   : > { %838 = vmatprep.subr.msk.bf16.mxu0 %vm1301_vm1, %v836_v29  ;;  %v412_v61 = vmul.f32 %v944_v4, %v1253_v21 }
  0xed   : > { %v610_v14 = vpop.permute.xlu0 %609 }
  0xee   : > { %v946_v1 = vpop.eup %945  ;;  %v839_v6 = vpack.c.bf16 %v412_v61, %v411_v2 }
  0xef   : > { %v948_v12 = vpop.eup %947  ;;  %v429_v62 = vmul.f32 %v946_v1, %v1262_v30  ;;  %v602_v30 = vlaneseq }
  0xf0   : > { %841 = vmatpush3.bf16.xpose.msk.msra.mxu0 %vm1301_vm1, %v839_v6  ;;  %v430_v13 = vmul.f32 %v948_v12, %v1265_v31 }
  0xf1   : > { %v603_v7 = vand.u32 127, %v602_v30 }
  0xf2   : > { %v950_v34 = vpop.eup %949  ;;  %v842_v63 = vpack.c.bf16 %v430_v13, %v429_v62 }
  0xf3   : > { %v952_v20 = vpop.eup %951  ;;  %v413_v5 = vmul.f32 %v950_v34, %v1274_v38  ;;  %v604_v31 = vadd.s32 128, %v603_v7  ;;  %v606_v11 = vadd.s32 %v605_v10, %v603_v7 }
  0xf4   : > { %844 = vmatprep.subr.msk.bf16.mxu0 %vm1301_vm1, %v842_v63  ;;  %v414_v21 = vmul.f32 %v952_v20, %v1277_v39 }
  0xf5   : > { %v607_v38 = vadd.s32 %v605_v10, %v604_v31  ;;  %vm611_vm2 = vcmp.eq.s32.totalorder %v606_v11, %v610_v14 }
  0xf6   : > { %v845_v35 = vpack.c.bf16 %v414_v21, %v413_v5 }
  0xf7   : > { %vm612_vm3 = vcmp.eq.s32.totalorder %v607_v38, %v610_v14 }
  0xf8   : > { %847 = vmatpush3.bf16.xpose.msk.msra.mxu0 %vm1301_vm1, %v845_v35 }
  0xff   : > { %799 = vmatmul.mubr.msk.f32.vlgmr.msra.gmra.mrb[0].mxu0 %vm238_vm0, %v1290_v50 }
 0x1d2   : > { %v596_v8 = vpop.f32.mrb[0].mxu0 }
 0x1d3   : > { %v613_v39 = vsel %vm611_vm2, %v596_v8, 0.0  ;;  %v598_v40 = vpop.f32.mrb[1].mxu0 }
 0x1d4   : > { %v614_v45 = vsel %vm612_vm3, %v598_v40, 0.0 }
 0x1d5   : > { %v615_v15 = vadd.f32 %v614_v45, %v613_v39 }
 0x1d7   : > { %616 = vadd.xlane.f32.xlu1 %v615_v15 }
 0x264   : > { %v617_v50 = vpop.xlane.xlu1 %616 }
 0x265   : > { %v618_v18 = vmul.f32 %v617_v50, %v617_v50  ;;  %v629_v16 = vmul.f32 0.87758255, %v617_v50  ;;  %v759_v33 = vadd.f32 -0.23971277, %v617_v50  ;;  %vm632_vm6 = vcmp.gt.f32.partialorder %v617_v50, -0.87758255 }
 0x267   : > { %v619_v41 = vsub.f32 1.0, %v618_v18 }
 0x269   : > { %v620_v9 = vmax.f32 %v619_v41, 0.0 }
 0x26b   : > { %v621_v19 = vmin.f32 %v620_v9, 1.0 }
 0x26d   : > { %953 = vrsqrt.f32 %v621_v19  ;;  %vm624_vm4 = vcmp.eq.f32.partialorder %v621_v19, inf  ;;  %v627_v26 = vand.u32 2147483648, %v621_v19  ;;  %vm626_vm5 = vcmp.eq.f32.partialorder %v621_v19, 0.0 }
 0x277   : > { %v954_v24 = vpop.eup %953 }
 0x278   : > { %v623_v25 = vmul.f32 %v954_v24, %v621_v19 }
 0x27a   : > { %v625_v46 = vsel %vm624_vm4, %v621_v19, %v623_v25 }
 0x27b   : > { %v628_v27 = vsel %vm626_vm5, %v627_v26, %v625_v46 }
 0x27c   : > { %v630_v47 = vmul.f32 0.47942555, %v628_v27 }
 0x27e   : > { %v631_v32 = vsub.f32 %v629_v16, %v630_v47 }
 0x280   : > { %v634_v17 = vsel %vm632_vm6, %v631_v32, %v759_v33 }
 0x281   : > { %v635_v36 = vsub.f32 %v634_v17, %v617_v50 }
 0x283   : > { %v636_v37 = vsel %vm611_vm2, %v635_v36, 0.0  ;;  %v637_v52 = vsel %vm612_vm3, %v635_v36, 0.0 }
 0x284   : > { %v638_v42 = vadd.f32 %v636_v37, %v596_v8  ;;  %v639_v43 = vadd.f32 %v637_v52, %v598_v40 }
 0x286   : > { %v640_v53 = vmul.f32 30.0, %v638_v42  ;;  %v641_v44 = vmul.f32 30.0, %v639_v43 }
 0x288   : > { %642 = vst [vmem:[%s164_s9] sm:$0xff] %v640_v53  ;;  %643 = vst [vmem:[%s164_s9 + $0x8] sm:$0xff] %v641_v44 }
 0x289   : > { %968 = shalt.err (!%p965_p3)
}
 0x28a   : > { %s969_s27 = scalar_lea.hbm %s1382_s19, 256  ;;  %s973_s30 = scalar_lea.hbm %s1427_s3, 512 }
 0x28b   : > { %p970_p4 = scmp.ne.s32.totalorder %s1382_s19, %s969_s27  ;;  %p974_p9 = scmp.lt.u32.totalorder %s1382_s19, %s1427_s3 }
 0x28c   : > { %p975_p10 = scmp.lt.u32.totalorder %s973_s30, %s969_s27  ;;  %p977_p12 = scmp.lt.u32.totalorder %s969_s27, %s1382_s19 }
 0x28d   : > { %p971_p7 = pnand %p970_p4, %p1079_p5 }
 0x28e   : > { %p976_p11 = por %p975_p10, %p974_p9 }
 0x28f   : > { %p972_p8 = pneg %p971_p7 }
 0x290   : > { %p978_p13 = por %p977_p12, %p976_p11 }
 0x292   : > { %p979_p0 = pnand %p978_p13, %p972_p8 }
 0x294   : > { %982 = shalt.err (!%p979_p0)
}
 0x295   : > { %848 = dma.vmem_to_hbm [thread:$0]  (%p1079_p5), %s1384_s10, 256, %s1382_s19, %s645_s20  }
 0x296 PF: > { %p854_p1 = scmp.ge.s32.totalorder %s1017_s15, 2  ;;  %s671_s6 = sand.u32 1, %s1005_s12  }
 0x297   : > { %s672_s7 = scalar_lea.sflag [#allocation3], %s671_s6 }
 0x298   : > { %p851_p2 = pnand %p854_p1, %p1083_p6 }
 0x29a   : > { %1000 = dma.done.wait (!%p851_p2), %s672_s7, 256  }
 0x29b   : > { %1002 = vsyncadd (!%p851_p2), %s672_s7, 4294967040  ;;  %p13_p3 = scmp.ge.s32.totalorder %s1066_s18, 4   ;;  %s1432_s12 = smov %s1009_s13 }
 0x29c   : > { %s1433_s13 = smov %s1013_s14  ;;  %s1434_s14 = smov %s1077_s21 }
 0x29d   : > { %s1435_s15 = smov %s1066_s18  ;;  %15 = sbr.rel (!%p13_p3) target bundleno = 3 (0x3), region = 67 }
 0x2a4   :  { %677 = vsyncpa [#allocation3], 1 }
 0x2a5   :  { %679 = vsyncpa [#allocation3 + $0x1], 1 }

</bundles_post_ra>
